<compile_context>
chip_gen: v5e
topology: v5e:2x2
jax: 0.10.0
libtpu: 0.0.40
codegen_flags: <defaults>
</compile_context>

<pallas_src>
import functools

import jax
import jax.numpy as jnp
import numpy as np
from jax.experimental import pallas as pl
from jax.experimental.pallas import tpu as pltpu

_MASK_NEG = -1e9                       # finite "minus infinity"
_VMEM_LIMIT = 48 * 1024 * 1024         # fits every generation's physical VMEM


# ---------------------------------------------------------------------------
# Kernel 1: LayerNorm + QKV projection, head-major outputs (H, tq, dh)
# ---------------------------------------------------------------------------
def _ln_qkv_kernel(x_ref, gamma_ref, beta_ref, wq_ref, wk_ref, wv_ref,
                   q_ref, k_ref, v_ref, *, heads, dim_head):
    # x_ref: (tq, D); gamma/beta: (1, D) f32; w{q,k,v}: (D, inner) compute dtype.
    x = x_ref[...].astype(jnp.float32)

    # LayerNorm (biased variance, eps=1e-5, affine) in f32.
    mean = jnp.mean(x, axis=-1, keepdims=True)
    var = jnp.mean(jnp.square(x - mean), axis=-1, keepdims=True)
    xn = (x - mean) * jax.lax.rsqrt(var + 1e-5)
    xn = xn * gamma_ref[...].astype(jnp.float32) + beta_ref[...].astype(jnp.float32)
    xn = xn.astype(wq_ref.dtype)        # bf16 (or f32) MXU inputs, f32 accumulation.

    # Full-width (tq, inner) matmuls (MXU-efficient). w_q already carries the
    # softmax scale (folded in the wrapper).
    q = jnp.dot(xn, wq_ref[...], preferred_element_type=jnp.float32)
    k = jnp.dot(xn, wk_ref[...], preferred_element_type=jnp.float32)
    v = jnp.dot(xn, wv_ref[...], preferred_element_type=jnp.float32)

    # Head split (static lane slices) + head-major store.  All relayout work
    # lives in this MXU/HBM-bound pass (VPU/XLU slots are free here), so pass 2
    # reads a clean (H, n, dh) layout and the wrapper needs no XLA transpose
    # (i.e. no extra HBM round trip between the passes).
    for h in range(heads):
        sl = slice(h * dim_head, (h + 1) * dim_head)
        q_ref[h] = q[:, sl].astype(q_ref.dtype)
        k_ref[h] = k[:, sl].astype(k_ref.dtype)
        v_ref[h] = v[:, sl].astype(v_ref.dtype)


# ---------------------------------------------------------------------------
# Kernel 2: flash attention (online softmax over kv tiles) + output projection
# ---------------------------------------------------------------------------
def _flash_attn_kernel(mask_ref, q_ref, k_ref, v_ref, wout_ref, o_ref,
                       m_sc, l_sc, acc_sc, *, heads, exp_dtype, approx_recip):
    # mask_ref: (tq, tk); q_ref: (H, tq, dh); k_ref/v_ref: (H, tk, dh)
    # wout_ref: (H, dh, D); o_ref: (tq, D)
    # scratch: m_sc/l_sc: (H, tq, 1) f32, acc_sc: (H, tq, dh) f32
    ki = pl.program_id(2)

    @pl.when(ki == 0)
    def _init():
        m_sc[...] = jnp.full_like(m_sc, -jnp.inf)
        l_sc[...] = jnp.zeros_like(l_sc)
        acc_sc[...] = jnp.zeros_like(acc_sc)

    q = q_ref[...]
    k = k_ref[...]
    v = v_ref[...]
    mask = mask_ref[...].astype(jnp.float32)              # (tq, tk), shared by heads

    # Batched score contraction over heads (q already carries the softmax scale).
    s = jnp.einsum('hqd,hkd->hqk', q, k,
                   preferred_element_type=jnp.float32)    # (H, tq, tk) f32
    s = s + mask[None, :, :]

    m_prev = m_sc[...]
    m_new = jnp.maximum(m_prev, jnp.max(s, axis=-1, keepdims=True))
    alpha = jnp.exp(m_prev - m_new)                       # rescale of running stats
    # On the bf16 path the exponent is evaluated in bf16 (EUP bf16 throughput on
    # v6e/v7x); p feeds the bf16 P@V matmul anyway.  f32 on the verify path.
    p = jnp.exp((s - m_new).astype(exp_dtype))            # (H, tq, tk)
    l_sc[...] = alpha * l_sc[...] + jnp.sum(p.astype(jnp.float32),
                                            axis=-1, keepdims=True)
    acc_sc[...] = alpha * acc_sc[...] + jnp.einsum(
        'hqk,hkd->hqd', p.astype(v.dtype), v, preferred_element_type=jnp.float32)
    m_sc[...] = m_new

    @pl.when(ki == pl.num_programs(2) - 1)
    def _finalize():
        inv_l = pl.reciprocal(l_sc[...], approx=approx_recip)       # (H, tq, 1)
        # Output projection fused with the head reduction: accumulate each
        # head's (tq, dh) @ (dh, D) straight into one (tq, D) f32 tile -- no
        # (H, tq, D) intermediate and no explicit axis-0 reduction.
        o_acc = None
        for h in range(heads):
            out_h = (acc_sc[h] * inv_l[h]).astype(wout_ref.dtype)   # (tq, dh)
            part = jnp.dot(out_h, wout_ref[h],
                           preferred_element_type=jnp.float32)      # (tq, D)
            o_acc = part if o_acc is None else o_acc + part
        o_ref[...] = o_acc.astype(o_ref.dtype)


# ---------------------------------------------------------------------------
# Tiling / padding policy
# ---------------------------------------------------------------------------
def _padded_len_and_tile(n):
    """Pad N and pick a seq tile: 256 if it divides, else 128; tiny N stays full."""
    if n <= 128:
        n_pad = ((n + 7) // 8) * 8          # sublane-align; single full tile
        return n_pad, n_pad
    n_pad = ((n + 127) // 128) * 128
    tile = 256 if n_pad % 256 == 0 else 128
    return n_pad, tile


# ---------------------------------------------------------------------------
# Wrapper
# ---------------------------------------------------------------------------
def attention_forward(x, mask, gamma, beta, w_qkv, w_out, *, heads, dim_head,
                      compute_dtype=jnp.bfloat16):
    """x: (B, N, D), mask: (B, N, N), w_qkv: (D, 3*inner), w_out: (inner, D)."""
    B, N, D = x.shape
    inner = heads * dim_head
    scale = float(dim_head) ** -0.5
    n_pad, tile = _padded_len_and_tile(N)
    tq = tk = tile

    # Pad sequence (zeros for x, large-negative for mask); slice output at end.
    if n_pad != N:
        x_p = jnp.pad(x, ((0, 0), (0, n_pad - N), (0, 0)))
        mask_p = jnp.pad(mask, ((0, 0), (0, n_pad - N), (0, n_pad - N)),
                         constant_values=_MASK_NEG)
    else:
        x_p, mask_p = x, mask
    # Clamp (-inf sentinels become finite, bf16 cast can't overflow to -inf).
    mask_c = jnp.maximum(mask_p, _MASK_NEG).astype(compute_dtype)

    gamma2 = gamma.reshape(1, D).astype(jnp.float32)
    beta2 = beta.reshape(1, D).astype(jnp.float32)
    # Three clean (D, inner) weights; softmax scale folded into w_q (one-time).
    wq = (w_qkv[:, 0 * inner:1 * inner] * scale).astype(compute_dtype)
    wk = w_qkv[:, 1 * inner:2 * inner].astype(compute_dtype)
    wv = w_qkv[:, 2 * inner:3 * inner].astype(compute_dtype)
    # Head-major output-projection weight: (inner, D) -> (H, dh, D).
    wout_r = w_out.reshape(heads, dim_head, D).astype(compute_dtype)

    # --- Pass 1: LayerNorm + QKV projection, head-major q/k/v outputs ---------
    qkv_shape = jax.ShapeDtypeStruct((B, heads, n_pad, dim_head), compute_dtype)
    q_h, k_h, v_h = pl.pallas_call(
        functools.partial(_ln_qkv_kernel, heads=heads, dim_head=dim_head),
        out_shape=(qkv_shape, qkv_shape, qkv_shape),
        grid_spec=pltpu.PrefetchScalarGridSpec(
            num_scalar_prefetch=0,
            grid=(B, n_pad // tq),
            in_specs=[
                pl.BlockSpec((None, tq, D), lambda b, n: (b, n, 0)),     # x
                pl.BlockSpec((1, D), lambda b, n: (0, 0)),               # gamma
                pl.BlockSpec((1, D), lambda b, n: (0, 0)),               # beta
                pl.BlockSpec((D, inner), lambda b, n: (0, 0)),           # w_q (scaled)
                pl.BlockSpec((D, inner), lambda b, n: (0, 0)),           # w_k
                pl.BlockSpec((D, inner), lambda b, n: (0, 0)),           # w_v
            ],
            out_specs=tuple(
                pl.BlockSpec((None, heads, tq, dim_head), lambda b, n: (b, 0, n, 0))
                for _ in range(3)),
        ),
        compiler_params=pltpu.CompilerParams(
            dimension_semantics=("parallel", "parallel"),
            vmem_limit_bytes=_VMEM_LIMIT),
    )(x_p, gamma2, beta2, wq, wk, wv)

    # --- Pass 2: flash attention + fused output projection --------------------
    exp_dtype = jnp.bfloat16 if compute_dtype == jnp.bfloat16 else jnp.float32
    out_p = pl.pallas_call(
        functools.partial(_flash_attn_kernel, heads=heads, exp_dtype=exp_dtype,
                          approx_recip=(compute_dtype != jnp.float32)),
        out_shape=jax.ShapeDtypeStruct((B, n_pad, D), x.dtype),
        grid_spec=pltpu.PrefetchScalarGridSpec(
            num_scalar_prefetch=0,
            grid=(B, n_pad // tq, n_pad // tk),
            in_specs=[
                pl.BlockSpec((None, tq, tk), lambda b, qi, ki: (b, qi, ki)),             # mask
                pl.BlockSpec((None, heads, tq, dim_head), lambda b, qi, ki: (b, 0, qi, 0)),  # q
                pl.BlockSpec((None, heads, tk, dim_head), lambda b, qi, ki: (b, 0, ki, 0)),  # k
                pl.BlockSpec((None, heads, tk, dim_head), lambda b, qi, ki: (b, 0, ki, 0)),  # v
                pl.BlockSpec((heads, dim_head, D), lambda b, qi, ki: (0, 0, 0)),         # w_out
            ],
            out_specs=pl.BlockSpec((None, tq, D), lambda b, qi, ki: (b, qi, 0)),
            scratch_shapes=[
                pltpu.VMEM((heads, tq, 1), jnp.float32),          # running max m
                pltpu.VMEM((heads, tq, 1), jnp.float32),          # running denom l
                pltpu.VMEM((heads, tq, dim_head), jnp.float32),   # running numerator
            ],
        ),
        compiler_params=pltpu.CompilerParams(
            dimension_semantics=("parallel", "parallel", "arbitrary"),
            vmem_limit_bytes=_VMEM_LIMIT),
    )(mask_c, q_h, k_h, v_h, wout_r)

    return out_p[:, :N, :] if n_pad != N else out_p


# ---------------------------------------------------------------------------
# Pure-JAX reference mirroring the PyTorch module
# ---------------------------------------------------------------------------
def attention_reference(x, mask, gamma, beta, w_qkv, w_out, *, heads, dim_head):
    B, N, D = x.shape
    inner = heads * dim_head
    scale = float(dim_head) ** -0.5
    mean = jnp.mean(x, axis=-1, keepdims=True)
    var = jnp.mean((x - mean) ** 2, axis=-1, keepdims=True)
    xn = (x - mean) / jnp.sqrt(var + 1e-5) * gamma + beta
    qkv = xn @ w_qkv
    q, k, v = jnp.split(qkv, 3, axis=-1)

    def to_heads(t):
        return t.reshape(B, N, heads, dim_head).transpose(0, 2, 1, 3)
    q, k, v = map(to_heads, (q, k, v))
    dots = jnp.einsum('bhnd,bhmd->bhnm', q, k) * scale
    dots = dots + mask[:, None, :, :]
    attn = jax.nn.softmax(dots, axis=-1)
    out = jnp.einsum('bhnm,bhmd->bhnd', attn, v)
    out = out.transpose(0, 2, 1, 3).reshape(B, N, inner)
    return out @ w_out


if __name__ == "__main__":
    B, N, D = 2, 8, 32
    heads, dim_head = 4, 8
    inner = heads * dim_head

    key = jax.random.PRNGKey(0)
    kx, km, kg, kb, kq, ko = jax.random.split(key, 6)

    x = jax.random.normal(kx, (B, N, D), dtype=jnp.float32)
    mask = 0.1 * jax.random.normal(km, (B, N, N), dtype=jnp.float32)

    gamma = jnp.ones((D,), jnp.float32) + 0.01 * jax.random.normal(kg, (D,), jnp.float32)
    beta = 0.01 * jax.random.normal(kb, (D,), jnp.float32)
    # PyTorch Linear weight is (out, in); store pre-transposed as (in, out).
    w_qkv = jax.random.normal(kq, (D, 3 * inner), dtype=jnp.float32) / jnp.sqrt(D)
    w_out = jax.random.normal(ko, (inner, D), dtype=jnp.float32) / jnp.sqrt(inner)

    ref = attention_reference(x, mask, gamma, beta, w_qkv, w_out,
                              heads=heads, dim_head=dim_head)

    # f32 verification path (exact math, tight tolerance).
    out_f32 = attention_forward(x, mask, gamma, beta, w_qkv, w_out,
                                heads=heads, dim_head=dim_head,
                                compute_dtype=jnp.float32)
    out_f32 = jax.block_until_ready(out_f32)
    np.testing.assert_allclose(np.asarray(out_f32), np.asarray(ref),
                               atol=2e-4, rtol=2e-4)

    # bf16 fast path (MXU-peak dtype, f32 accumulation) — bf16-level tolerance.
    out_bf16 = attention_forward(x, mask, gamma, beta, w_qkv, w_out,
                                 heads=heads, dim_head=dim_head,
                                 compute_dtype=jnp.bfloat16)
    out_bf16 = jax.block_until_ready(out_bf16)
    np.testing.assert_allclose(np.asarray(out_bf16), np.asarray(ref),
                               atol=1.2e-1, rtol=1e-1)

    # Non-tile-aligned sequence length exercises the padding path (N=12 -> 16).
    N2 = 12
    x2 = jax.random.normal(kx, (B, N2, D), dtype=jnp.float32)
    mask2 = 0.1 * jax.random.normal(km, (B, N2, N2), dtype=jnp.float32)
    ref2 = attention_reference(x2, mask2, gamma, beta, w_qkv, w_out,
                               heads=heads, dim_head=dim_head)
    out2 = attention_forward(x2, mask2, gamma, beta, w_qkv, w_out,
                             heads=heads, dim_head=dim_head,
                             compute_dtype=jnp.float32)
    out2 = jax.block_until_ready(out2)
    np.testing.assert_allclose(np.asarray(out2), np.asarray(ref2),
                               atol=2e-4, rtol=2e-4)

    print("KERNEL_OK")
</pallas_src>

<mosaic_0001>
module attributes {stable_mosaic.version = 11 : i64} {
  func.func @_ln_qkv_kernel(%arg0: i32, %arg1: i32, %arg2: memref<1x8x32xf32, #tpu.memory_space<vmem>>, %arg3: memref<1x32xf32, #tpu.memory_space<vmem>>, %arg4: memref<1x32xf32, #tpu.memory_space<vmem>>, %arg5: memref<32x32xf32, #tpu.memory_space<vmem>>, %arg6: memref<32x32xf32, #tpu.memory_space<vmem>>, %arg7: memref<32x32xf32, #tpu.memory_space<vmem>>, %arg8: memref<1x4x8x8xf32, #tpu.memory_space<vmem>>, %arg9: memref<1x4x8x8xf32, #tpu.memory_space<vmem>>, %arg10: memref<1x4x8x8xf32, #tpu.memory_space<vmem>>) attributes {dimension_semantics = [#tpu.dimension_semantics<parallel>, #tpu.dimension_semantics<parallel>], iteration_bounds = array<i64: 2, 1>, scalar_prefetch = 0 : i64, scratch_operands = 0 : i64, tpu.core_type = #tpu.core_type<tc>, window_params = [{transform_indices = @transform_0, window_bounds = array<i64: 1, 8, 32>}, {pipeline_mode = #tpu.pipeline_mode<synchronous>, transform_indices = @transform_1, window_bounds = array<i64: 1, 32>}, {pipeline_mode = #tpu.pipeline_mode<synchronous>, transform_indices = @transform_2, window_bounds = array<i64: 1, 32>}, {pipeline_mode = #tpu.pipeline_mode<synchronous>, transform_indices = @transform_3, window_bounds = array<i64: 32, 32>}, {pipeline_mode = #tpu.pipeline_mode<synchronous>, transform_indices = @transform_4, window_bounds = array<i64: 32, 32>}, {pipeline_mode = #tpu.pipeline_mode<synchronous>, transform_indices = @transform_5, window_bounds = array<i64: 32, 32>}, {transform_indices = @transform_6, window_bounds = array<i64: 1, 4, 8, 8>}, {transform_indices = @transform_7, window_bounds = array<i64: 1, 4, 8, 8>}, {transform_indices = @transform_8, window_bounds = array<i64: 1, 4, 8, 8>}]} {
    %c0 = arith.constant 0 : index
    %c0_0 = arith.constant 0 : index
    %c0_1 = arith.constant 0 : index
    %0 = vector.load %arg2[%c0, %c0_0, %c0_1] : memref<1x8x32xf32, #tpu.memory_space<vmem>>, vector<1x8x32xf32>
    %1 = vector.shape_cast %0 : vector<1x8x32xf32> to vector<8x32xf32>
    %cst = arith.constant dense<0.000000e+00> : vector<8xf32>
    %2 = vector.multi_reduction <add>, %1, %cst [1] : vector<8x32xf32> to vector<8xf32>
    %3 = vector.shape_cast %2 : vector<8xf32> to vector<8x1xf32>
    %cst_2 = arith.constant 3.200000e+01 : f32
    %4 = vector.broadcast %cst_2 : f32 to vector<8x1xf32>
    %5 = arith.divf %3, %4 : vector<8x1xf32>
    %6 = vector.broadcast %5 : vector<8x1xf32> to vector<8x32xf32>
    %7 = arith.subf %1, %6 : vector<8x32xf32>
    %8 = arith.mulf %7, %7 : vector<8x32xf32>
    %cst_3 = arith.constant dense<0.000000e+00> : vector<8xf32>
    %9 = vector.multi_reduction <add>, %8, %cst_3 [1] : vector<8x32xf32> to vector<8xf32>
    %10 = vector.shape_cast %9 : vector<8xf32> to vector<8x1xf32>
    %cst_4 = arith.constant 3.200000e+01 : f32
    %11 = vector.broadcast %cst_4 : f32 to vector<8x1xf32>
    %12 = arith.divf %10, %11 : vector<8x1xf32>
    %13 = vector.broadcast %5 : vector<8x1xf32> to vector<8x32xf32>
    %14 = arith.subf %1, %13 : vector<8x32xf32>
    %cst_5 = arith.constant 9.99999974E-6 : f32
    %15 = vector.broadcast %cst_5 : f32 to vector<8x1xf32>
    %16 = arith.addf %12, %15 : vector<8x1xf32>
    %17 = math.rsqrt %16 : vector<8x1xf32>
    %18 = vector.broadcast %17 : vector<8x1xf32> to vector<8x32xf32>
    %19 = arith.mulf %14, %18 : vector<8x32xf32>
    %c0_6 = arith.constant 0 : index
    %c0_7 = arith.constant 0 : index
    %20 = vector.load %arg3[%c0_6, %c0_7] : memref<1x32xf32, #tpu.memory_space<vmem>>, vector<1x32xf32>
    %21 = vector.broadcast %20 : vector<1x32xf32> to vector<8x32xf32>
    %22 = arith.mulf %19, %21 : vector<8x32xf32>
    %c0_8 = arith.constant 0 : index
    %c0_9 = arith.constant 0 : index
    %23 = vector.load %arg4[%c0_8, %c0_9] : memref<1x32xf32, #tpu.memory_space<vmem>>, vector<1x32xf32>
    %24 = vector.broadcast %23 : vector<1x32xf32> to vector<8x32xf32>
    %25 = arith.addf %22, %24 : vector<8x32xf32>
    %c0_10 = arith.constant 0 : index
    %c0_11 = arith.constant 0 : index
    %26 = vector.load %arg5[%c0_10, %c0_11] : memref<32x32xf32, #tpu.memory_space<vmem>>, vector<32x32xf32>
    %cst_12 = arith.constant dense<0.000000e+00> : vector<8x32xf32>
    %27 = tpu.matmul %25, %26, %cst_12 {dimension_numbers = #tpu.dot_dimension_numbers<[1], [0], [0], [1], [0, 0, 1, 1], [], []>} : vector<8x32xf32>, vector<32x32xf32>, vector<8x32xf32> -> vector<8x32xf32>
    %c0_13 = arith.constant 0 : index
    %c0_14 = arith.constant 0 : index
    %28 = vector.load %arg6[%c0_13, %c0_14] : memref<32x32xf32, #tpu.memory_space<vmem>>, vector<32x32xf32>
    %cst_15 = arith.constant dense<0.000000e+00> : vector<8x32xf32>
    %29 = tpu.matmul %25, %28, %cst_15 {dimension_numbers = #tpu.dot_dimension_numbers<[1], [0], [0], [1], [0, 0, 1, 1], [], []>} : vector<8x32xf32>, vector<32x32xf32>, vector<8x32xf32> -> vector<8x32xf32>
    %c0_16 = arith.constant 0 : index
    %c0_17 = arith.constant 0 : index
    %30 = vector.load %arg7[%c0_16, %c0_17] : memref<32x32xf32, #tpu.memory_space<vmem>>, vector<32x32xf32>
    %cst_18 = arith.constant dense<0.000000e+00> : vector<8x32xf32>
    %31 = tpu.matmul %25, %30, %cst_18 {dimension_numbers = #tpu.dot_dimension_numbers<[1], [0], [0], [1], [0, 0, 1, 1], [], []>} : vector<8x32xf32>, vector<32x32xf32>, vector<8x32xf32> -> vector<8x32xf32>
    %32 = vector.extract_strided_slice %27 {offsets = [0, 0], sizes = [8, 8], strides = [1, 1]} : vector<8x32xf32> to vector<8x8xf32>
    %c0_19 = arith.constant 0 : index
    %c0_20 = arith.constant 0 : index
    %c0_21 = arith.constant 0 : index
    %c0_22 = arith.constant 0 : index
    %33 = vector.load %arg8[%c0_19, %c0_20, %c0_21, %c0_22] : memref<1x4x8x8xf32, #tpu.memory_space<vmem>>, vector<1x1x8x8xf32>
    %34 = vector.shape_cast %33 : vector<1x1x8x8xf32> to vector<8x8xf32>
    %35 = vector.shape_cast %32 : vector<8x8xf32> to vector<1x1x8x8xf32>
    tpu.vector_store %arg8[%c0_19, %c0_20, %c0_21, %c0_22], %35 {strides = array<i32>} : memref<1x4x8x8xf32, #tpu.memory_space<vmem>>, vector<1x1x8x8xf32>,
    %36 = vector.extract_strided_slice %29 {offsets = [0, 0], sizes = [8, 8], strides = [1, 1]} : vector<8x32xf32> to vector<8x8xf32>
    %c0_23 = arith.constant 0 : index
    %c0_24 = arith.constant 0 : index
    %c0_25 = arith.constant 0 : index
    %c0_26 = arith.constant 0 : index
    %37 = vector.load %arg9[%c0_23, %c0_24, %c0_25, %c0_26] : memref<1x4x8x8xf32, #tpu.memory_space<vmem>>, vector<1x1x8x8xf32>
    %38 = vector.shape_cast %37 : vector<1x1x8x8xf32> to vector<8x8xf32>
    %39 = vector.shape_cast %36 : vector<8x8xf32> to vector<1x1x8x8xf32>
    tpu.vector_store %arg9[%c0_23, %c0_24, %c0_25, %c0_26], %39 {strides = array<i32>} : memref<1x4x8x8xf32, #tpu.memory_space<vmem>>, vector<1x1x8x8xf32>,
    %40 = vector.extract_strided_slice %31 {offsets = [0, 0], sizes = [8, 8], strides = [1, 1]} : vector<8x32xf32> to vector<8x8xf32>
    %c0_27 = arith.constant 0 : index
    %c0_28 = arith.constant 0 : index
    %c0_29 = arith.constant 0 : index
    %c0_30 = arith.constant 0 : index
    %41 = vector.load %arg10[%c0_27, %c0_28, %c0_29, %c0_30] : memref<1x4x8x8xf32, #tpu.memory_space<vmem>>, vector<1x1x8x8xf32>
    %42 = vector.shape_cast %41 : vector<1x1x8x8xf32> to vector<8x8xf32>
    %43 = vector.shape_cast %40 : vector<8x8xf32> to vector<1x1x8x8xf32>
    tpu.vector_store %arg10[%c0_27, %c0_28, %c0_29, %c0_30], %43 {strides = array<i32>} : memref<1x4x8x8xf32, #tpu.memory_space<vmem>>, vector<1x1x8x8xf32>,
    %44 = vector.extract_strided_slice %27 {offsets = [0, 8], sizes = [8, 8], strides = [1, 1]} : vector<8x32xf32> to vector<8x8xf32>
    %c0_31 = arith.constant 0 : index
    %c1 = arith.constant 1 : index
    %c0_32 = arith.constant 0 : index
    %c0_33 = arith.constant 0 : index
    %45 = vector.load %arg8[%c0_31, %c1, %c0_32, %c0_33] : memref<1x4x8x8xf32, #tpu.memory_space<vmem>>, vector<1x1x8x8xf32>
    %46 = vector.shape_cast %45 : vector<1x1x8x8xf32> to vector<8x8xf32>
    %47 = vector.shape_cast %44 : vector<8x8xf32> to vector<1x1x8x8xf32>
    tpu.vector_store %arg8[%c0_31, %c1, %c0_32, %c0_33], %47 {strides = array<i32>} : memref<1x4x8x8xf32, #tpu.memory_space<vmem>>, vector<1x1x8x8xf32>,
    %48 = vector.extract_strided_slice %29 {offsets = [0, 8], sizes = [8, 8], strides = [1, 1]} : vector<8x32xf32> to vector<8x8xf32>
    %c0_34 = arith.constant 0 : index
    %c1_35 = arith.constant 1 : index
    %c0_36 = arith.constant 0 : index
    %c0_37 = arith.constant 0 : index
    %49 = vector.load %arg9[%c0_34, %c1_35, %c0_36, %c0_37] : memref<1x4x8x8xf32, #tpu.memory_space<vmem>>, vector<1x1x8x8xf32>
    %50 = vector.shape_cast %49 : vector<1x1x8x8xf32> to vector<8x8xf32>
    %51 = vector.shape_cast %48 : vector<8x8xf32> to vector<1x1x8x8xf32>
    tpu.vector_store %arg9[%c0_34, %c1_35, %c0_36, %c0_37], %51 {strides = array<i32>} : memref<1x4x8x8xf32, #tpu.memory_space<vmem>>, vector<1x1x8x8xf32>,
    %52 = vector.extract_strided_slice %31 {offsets = [0, 8], sizes = [8, 8], strides = [1, 1]} : vector<8x32xf32> to vector<8x8xf32>
    %c0_38 = arith.constant 0 : index
    %c1_39 = arith.constant 1 : index
    %c0_40 = arith.constant 0 : index
    %c0_41 = arith.constant 0 : index
    %53 = vector.load %arg10[%c0_38, %c1_39, %c0_40, %c0_41] : memref<1x4x8x8xf32, #tpu.memory_space<vmem>>, vector<1x1x8x8xf32>
    %54 = vector.shape_cast %53 : vector<1x1x8x8xf32> to vector<8x8xf32>
    %55 = vector.shape_cast %52 : vector<8x8xf32> to vector<1x1x8x8xf32>
    tpu.vector_store %arg10[%c0_38, %c1_39, %c0_40, %c0_41], %55 {strides = array<i32>} : memref<1x4x8x8xf32, #tpu.memory_space<vmem>>, vector<1x1x8x8xf32>,
    %56 = vector.extract_strided_slice %27 {offsets = [0, 16], sizes = [8, 8], strides = [1, 1]} : vector<8x32xf32> to vector<8x8xf32>
    %c0_42 = arith.constant 0 : index
    %c2 = arith.constant 2 : index
    %c0_43 = arith.constant 0 : index
    %c0_44 = arith.constant 0 : index
    %57 = vector.load %arg8[%c0_42, %c2, %c0_43, %c0_44] : memref<1x4x8x8xf32, #tpu.memory_space<vmem>>, vector<1x1x8x8xf32>
    %58 = vector.shape_cast %57 : vector<1x1x8x8xf32> to vector<8x8xf32>
    %59 = vector.shape_cast %56 : vector<8x8xf32> to vector<1x1x8x8xf32>
    tpu.vector_store %arg8[%c0_42, %c2, %c0_43, %c0_44], %59 {strides = array<i32>} : memref<1x4x8x8xf32, #tpu.memory_space<vmem>>, vector<1x1x8x8xf32>,
    %60 = vector.extract_strided_slice %29 {offsets = [0, 16], sizes = [8, 8], strides = [1, 1]} : vector<8x32xf32> to vector<8x8xf32>
    %c0_45 = arith.constant 0 : index
    %c2_46 = arith.constant 2 : index
    %c0_47 = arith.constant 0 : index
    %c0_48 = arith.constant 0 : index
    %61 = vector.load %arg9[%c0_45, %c2_46, %c0_47, %c0_48] : memref<1x4x8x8xf32, #tpu.memory_space<vmem>>, vector<1x1x8x8xf32>
    %62 = vector.shape_cast %61 : vector<1x1x8x8xf32> to vector<8x8xf32>
    %63 = vector.shape_cast %60 : vector<8x8xf32> to vector<1x1x8x8xf32>
    tpu.vector_store %arg9[%c0_45, %c2_46, %c0_47, %c0_48], %63 {strides = array<i32>} : memref<1x4x8x8xf32, #tpu.memory_space<vmem>>, vector<1x1x8x8xf32>,
    %64 = vector.extract_strided_slice %31 {offsets = [0, 16], sizes = [8, 8], strides = [1, 1]} : vector<8x32xf32> to vector<8x8xf32>
    %c0_49 = arith.constant 0 : index
    %c2_50 = arith.constant 2 : index
    %c0_51 = arith.constant 0 : index
    %c0_52 = arith.constant 0 : index
    %65 = vector.load %arg10[%c0_49, %c2_50, %c0_51, %c0_52] : memref<1x4x8x8xf32, #tpu.memory_space<vmem>>, vector<1x1x8x8xf32>
    %66 = vector.shape_cast %65 : vector<1x1x8x8xf32> to vector<8x8xf32>
    %67 = vector.shape_cast %64 : vector<8x8xf32> to vector<1x1x8x8xf32>
    tpu.vector_store %arg10[%c0_49, %c2_50, %c0_51, %c0_52], %67 {strides = array<i32>} : memref<1x4x8x8xf32, #tpu.memory_space<vmem>>, vector<1x1x8x8xf32>,
    %68 = vector.extract_strided_slice %27 {offsets = [0, 24], sizes = [8, 8], strides = [1, 1]} : vector<8x32xf32> to vector<8x8xf32>
    %c0_53 = arith.constant 0 : index
    %c3 = arith.constant 3 : index
    %c0_54 = arith.constant 0 : index
    %c0_55 = arith.constant 0 : index
    %69 = vector.load %arg8[%c0_53, %c3, %c0_54, %c0_55] : memref<1x4x8x8xf32, #tpu.memory_space<vmem>>, vector<1x1x8x8xf32>
    %70 = vector.shape_cast %69 : vector<1x1x8x8xf32> to vector<8x8xf32>
    %71 = vector.shape_cast %68 : vector<8x8xf32> to vector<1x1x8x8xf32>
    tpu.vector_store %arg8[%c0_53, %c3, %c0_54, %c0_55], %71 {strides = array<i32>} : memref<1x4x8x8xf32, #tpu.memory_space<vmem>>, vector<1x1x8x8xf32>,
    %72 = vector.extract_strided_slice %29 {offsets = [0, 24], sizes = [8, 8], strides = [1, 1]} : vector<8x32xf32> to vector<8x8xf32>
    %c0_56 = arith.constant 0 : index
    %c3_57 = arith.constant 3 : index
    %c0_58 = arith.constant 0 : index
    %c0_59 = arith.constant 0 : index
    %73 = vector.load %arg9[%c0_56, %c3_57, %c0_58, %c0_59] : memref<1x4x8x8xf32, #tpu.memory_space<vmem>>, vector<1x1x8x8xf32>
    %74 = vector.shape_cast %73 : vector<1x1x8x8xf32> to vector<8x8xf32>
    %75 = vector.shape_cast %72 : vector<8x8xf32> to vector<1x1x8x8xf32>
    tpu.vector_store %arg9[%c0_56, %c3_57, %c0_58, %c0_59], %75 {strides = array<i32>} : memref<1x4x8x8xf32, #tpu.memory_space<vmem>>, vector<1x1x8x8xf32>,
    %76 = vector.extract_strided_slice %31 {offsets = [0, 24], sizes = [8, 8], strides = [1, 1]} : vector<8x32xf32> to vector<8x8xf32>
    %c0_60 = arith.constant 0 : index
    %c3_61 = arith.constant 3 : index
    %c0_62 = arith.constant 0 : index
    %c0_63 = arith.constant 0 : index
    %77 = vector.load %arg10[%c0_60, %c3_61, %c0_62, %c0_63] : memref<1x4x8x8xf32, #tpu.memory_space<vmem>>, vector<1x1x8x8xf32>
    %78 = vector.shape_cast %77 : vector<1x1x8x8xf32> to vector<8x8xf32>
    %79 = vector.shape_cast %76 : vector<8x8xf32> to vector<1x1x8x8xf32>
    tpu.vector_store %arg10[%c0_60, %c3_61, %c0_62, %c0_63], %79 {strides = array<i32>} : memref<1x4x8x8xf32, #tpu.memory_space<vmem>>, vector<1x1x8x8xf32>,
    return
  }
  func.func @transform_0(%arg0: i32, %arg1: i32) -> (i32, i32, i32) {
    %c0_i32 = arith.constant 0 : i32
    %c0_i32_0 = arith.constant 0 : i32
    return %arg0, %arg1, %c0_i32 : i32, i32, i32
  }
  func.func @transform_1(%arg0: i32, %arg1: i32) -> (i32, i32) {
    %c0_i32 = arith.constant 0 : i32
    %c0_i32_0 = arith.constant 0 : i32
    %c0_i32_1 = arith.constant 0 : i32
    return %c0_i32, %c0_i32_0 : i32, i32
  }
  func.func @transform_2(%arg0: i32, %arg1: i32) -> (i32, i32) {
    %c0_i32 = arith.constant 0 : i32
    %c0_i32_0 = arith.constant 0 : i32
    %c0_i32_1 = arith.constant 0 : i32
    return %c0_i32, %c0_i32_0 : i32, i32
  }
  func.func @transform_3(%arg0: i32, %arg1: i32) -> (i32, i32) {
    %c0_i32 = arith.constant 0 : i32
    %c0_i32_0 = arith.constant 0 : i32
    %c0_i32_1 = arith.constant 0 : i32
    return %c0_i32, %c0_i32_0 : i32, i32
  }
  func.func @transform_4(%arg0: i32, %arg1: i32) -> (i32, i32) {
    %c0_i32 = arith.constant 0 : i32
    %c0_i32_0 = arith.constant 0 : i32
    %c0_i32_1 = arith.constant 0 : i32
    return %c0_i32, %c0_i32_0 : i32, i32
  }
  func.func @transform_5(%arg0: i32, %arg1: i32) -> (i32, i32) {
    %c0_i32 = arith.constant 0 : i32
    %c0_i32_0 = arith.constant 0 : i32
    %c0_i32_1 = arith.constant 0 : i32
    return %c0_i32, %c0_i32_0 : i32, i32
  }
  func.func @transform_6(%arg0: i32, %arg1: i32) -> (i32, i32, i32, i32) {
    %c0_i32 = arith.constant 0 : i32
    %c0_i32_0 = arith.constant 0 : i32
    %c0_i32_1 = arith.constant 0 : i32
    return %arg0, %c0_i32, %arg1, %c0_i32_0 : i32, i32, i32, i32
  }
  func.func @transform_7(%arg0: i32, %arg1: i32) -> (i32, i32, i32, i32) {
    %c0_i32 = arith.constant 0 : i32
    %c0_i32_0 = arith.constant 0 : i32
    %c0_i32_1 = arith.constant 0 : i32
    return %arg0, %c0_i32, %arg1, %c0_i32_0 : i32, i32, i32, i32
  }
  func.func @transform_8(%arg0: i32, %arg1: i32) -> (i32, i32, i32, i32) {
    %c0_i32 = arith.constant 0 : i32
    %c0_i32_0 = arith.constant 0 : i32
    %c0_i32_1 = arith.constant 0 : i32
    return %arg0, %c0_i32, %arg1, %c0_i32_0 : i32, i32, i32, i32
  }
}

</mosaic_0001>

<bundles_post_ra>
// kernel: tpu_custom_call.1
= control target key start
LH: loop header
LB: loop body
LE: loop exit
PB: predicated region body
PF: predicated region fallthrough
CT: control target
= control target key end

     0   :  { %s1646_s0 = inlined_call_operand.hbm [shape: f32[2,8,32], index: 0, kind: input, shape index: {}]   ;;  %s1647_s1 = inlined_call_operand.hbm [shape: f32[1,32], index: 1, kind: input, shape index: {}]   ;;  %s1648_s2 = inlined_call_operand.vmem [shape: f32[1,32], index: 2, kind: input, shape index: {}]   ;;  %s1649_s3 = inlined_call_operand.hbm [shape: f32[32,32], index: 3, kind: input, shape index: {}]   ;;  %s1650_s4 = inlined_call_operand.hbm [shape: f32[32,32], index: 4, kind: input, shape index: {}]   ;;  %s1651_s5 = inlined_call_operand.hbm [shape: f32[32,32], index: 5, kind: input, shape index: {}]   ;;  %s1652_s6 = inlined_call_operand.hbm [shape: f32[2,4,8,8], index: 6, kind: output, shape index: {0}]   ;;  %s1653_s7 = inlined_call_operand.hbm [shape: f32[2,4,8,8], index: 7, kind: output, shape index: {1}]   ;;  %s1654_s8 = inlined_call_operand.hbm [shape: f32[2,4,8,8], index: 8, kind: output, shape index: {2}]  }
   0x1   :  { %1656 = sst [smem:[#allocation20_spill]] %s1646_s0 }
   0x2   :  { %1657 = sst [smem:[#allocation21_spill]] %s1647_s1 }
   0x3   :  { %1658 = sst [smem:[#allocation22_spill]] %s1648_s2 }
   0x4   :  { %1659 = sst [smem:[#allocation23_spill]] %s1649_s3 }
   0x5   :  { %1660 = sst [smem:[#allocation24_spill]] %s1650_s4 }
   0x6   :  { %14 = vsyncpa [#allocation3], 0 }
   0x7   :  { %16 = vsyncpa [#allocation3 + $0x1], 0 }
   0x8   :  { %17 = vsyncpa [#allocation6], 0 }
   0x9   :  { %18 = vsyncpa [#allocation9], 0 }
   0xa   :  { %19 = vsyncpa [#allocation4], 0 }
   0xb   :  { %21 = vsyncpa [#allocation4 + $0x1], 0 }
   0xc   :  { %22 = vsyncpa [#allocation13], 0 }
   0xd   :  { %24 = vsyncpa [#allocation13 + $0x1], 0  ;;  %s1377_s27 = smov 0   ;;  %s1379_s28 = smov 0  }
   0xe   :  { %s1381_s29 = smov 0   ;;  %s1383_s30 = smov 0  }
   0xf   :  { %s1385_s9 = smov 0   ;;  %s1387_s10 = smov 0  }
  0x10 LB: > { %s1408_s11 = sadd.s32 4294967295, %s1318_s10   ;;  %p848_p0 = scmp.ge.s32.totalorder %s1318_s10, 1  ;;  %s1318_s10 = sphi %s1387_s10, %s30_s10   ;;  %s1314_s9 = sphi %s1385_s9, %s1676_s9   ;;  %s1310_s30 = sphi %s1383_s30, %s1675_s30   ;;  %s1306_s29 = sphi %s1381_s29, %s1674_s29   ;;  %s1302_s28 = sphi %s1379_s28, %s1673_s28   ;;  %s1298_s27 = sphi %s1377_s27, %s1672_s27  }
  0x11   : > { %p65_p1 = scmp.eq.s32.totalorder %s1408_s11, 0  ;;  %p264_p2 = scmp.lt.s32.totalorder %s1318_s10, 3 }
  0x12   : > { %s1661_s1 = sld [smem:[#allocation21_spill]]  ;;  %p853_p4 = scmp.ge.s32.totalorder %s1318_s10, 2 }
  0x13   : > { %p1416_p3 = pnand %p848_p0, %p264_p2  ;;  %s1320_s16 = smov [#allocation5]  }
  0x14   : > { %s278_s17 = sshll.u32 %s1320_s16, 4  ;;  %s1664_s4 = sld [smem:[#allocation24_spill]]  ;;  %s279_s17 = int_to_ptr.vmem [resolvable:$true] %s278_s17 }
  0x15   : > { %p915_p5 = pneg %p1416_p3  ;;  %s1321_s22 = smov [#allocation8]  }
  0x16   : > { %s306_s23 = sshll.u32 %s1321_s22, 4  ;;  %s1665_s3 = sld [smem:[#allocation23_spill]]  ;;  %s307_s23 = int_to_ptr.vmem [resolvable:$true] %s306_s23 }
  0x17   : > { %p1425_p6 = pnand %p915_p5, %p65_p1  ;;  %s1322_s12 = smov 128  }
  0x18   : > { %s276_s14 = sshll.u32 %s1661_s1, 4  ;;  %s1323_s13 = smov 8   ;;  %s277_s14 = int_to_ptr.hbm [resolvable:$true] %s276_s14 }
  0x19   : > { %918 = dma.hbm_to_vmem [thread:$0]  (!%p1425_p6), %s277_s14, 16, %s279_s17, [#allocation6]  }
  0x1a   : > { %s304_s21 = sshll.u32 %s1664_s4, 4  ;;  %s318_s17 = sshll.u32 %s1651_s5, 4  ;;  %s305_s21 = int_to_ptr.hbm [resolvable:$true] %s304_s21  ;;  %s319_s17 = int_to_ptr.hbm [resolvable:$true] %s318_s17 }
  0x1b   : > { %924 = dma.hbm_to_vmem [thread:$0]  (!%p1425_p6), %s305_s21, 512, %s307_s23, [#allocation9], %s1322_s12, %s1322_s12, %s1323_s13  }
  0x1c   : > { %s290_s26 = sshll.u32 %s1665_s3, 4  ;;  %s1324_s19 = smov [#allocation7]   ;;  %s291_s26 = int_to_ptr.hbm [resolvable:$true] %s290_s26 }
  0x1d   : > { %s292_s20 = sshll.u32 %s1324_s19, 4  ;;  %s1325_s22 = smov [#allocation10]   ;;  %s293_s20 = int_to_ptr.vmem [resolvable:$true] %s292_s20 }
  0x1e   : > { %921 = dma.hbm_to_vmem [thread:$0]  (!%p1425_p6), %s291_s26, 512, %s293_s20, [#allocation6], %s1322_s12, %s1322_s12, %s1323_s13  }
  0x1f   : > { %s320_s24 = sshll.u32 %s1325_s22, 4  ;;  %s42_s21 = sadd.s32 1, %s1314_s9  ;;  %s321_s24 = int_to_ptr.vmem [resolvable:$true] %s320_s24 }
  0x20   : > { %927 = dma.hbm_to_vmem [thread:$0]  (!%p1425_p6), %s319_s17, 512, %s321_s24, [#allocation9], %s1322_s12, %s1322_s12, %s1323_s13  }
  0x21   : > { %s1655_s23 = sadd.s32 4294967294, %s1318_s10   ;;  %p44_p7 = scmp.ge.s32.totalorder %s42_s21, 2 }
  0x22   : > { %s51_s25 = sadd.s32 1, %s1306_s29  ;;  %p58_p8 = scmp.ne.s32.totalorder %s1306_s29, %s1302_s28 }
  0x23   : > { %s1678_s21 = smov (%p44_p7, %s42_s21), 0  ;;  %p59_p9 = scmp.eq.s32.totalorder %s1318_s10, 0 }
  0x24   : > { %p64_p10 = scmp.ne.s32.totalorder %s1302_s28, %s1298_s27  ;;  %s46_s26 = ssub.s32 %s1314_s9, %s1678_s21 }
  0x25   : > { %p195_p11 = scmp.eq.s32.totalorder %s1408_s11, 1  ;;  %p49_p12 = scmp.eq.s32.totalorder %s46_s26, 0 }
  0x26   : > { %p1461_p13 = por %p65_p1, %p64_p10  ;;  %p201_p2 = scmp.eq.s32.totalorder %s1655_s23, 1 }
  0x27   : > { %p1465_p0 = por %p195_p11, %p58_p8  ;;  %p60_p5 = por %p59_p9, %p58_p8 }
  0x28   : > { %s1472_s13 = scalar_select %p49_p12, %s1306_s29, %s51_s25  }
  0x29   : > { %p1474_p6 = por %p201_p2, %p64_p10  ;;  %s334_s14 = sand.u32 1, %s1306_s29  }
  0x2a   : > { %s855_s17 = sshll.u32 %s1314_s9, 3  ;;  %p946_p7 = scmp.lt.s32.totalorder %s1318_s10, 2 }
  0x2b   : > { %s854_s19 = sshll.u32 %s334_s14, 3  ;;  %s1669_s0 = sld [smem:[#allocation20_spill]] }
  0x2c   : > { %s338_s1 = scalar_lea.vmem [#allocation2], %s854_s19  ;;  %p929_p11 = pnand %p946_p7, %p60_p5 }
  0x2d   : > { %s347_s3 = sshll.u32 %s338_s1, 4  ;;  %s335_s25 = scalar_lea.sflag [#allocation3], %s334_s14  ;;  %s348_s3 = int_to_ptr.vmem [resolvable:$true] %s347_s3 }
  0x2e   : > { %s1487_s23 = sand.u32 (!%p1416_p3), 1, %s1302_s28  }
  0x2f   : > { %356 = sbr.rel (%p1416_p3) target bundleno = 605 (0x25d), region = 44  ;;  %s857_s4 = sshll.u32 (!%p1416_p3), %s1487_s23, 3 }
  0x30   : > { %s359_s20 = scalar_lea.sflag (!%p1416_p3), [#allocation3], %s1487_s23 }
  0x31   : > { %s343_s24 = scalar_lea.hbm %s1669_s0, %s855_s17  ;;  %s362_s17 = scalar_lea.vmem (!%p1416_p3), [#allocation2], %s857_s4 }
  0x32   : > { %s345_s26 = sshll.u32 %s343_s24, 4  ;;  %s346_s26 = int_to_ptr.hbm [resolvable:$true] %s345_s26 }
  0x33   : > { %931 = dma.hbm_to_vmem [thread:$0]  (!%p929_p11), %s346_s26, 128, %s348_s3, %s335_s25  }
  0x34   : > { %1277 = dma.done.wait (%p1461_p13), %s359_s20, 128  }
  0x35   : > { %1279 = vsyncadd (%p1461_p13), %s359_s20, 4294967168 }
  0x36   : > { %1281 = dma.done.wait (%p65_p1), [#allocation6], 528  }
  0x37   : > { %1283 = vsyncadd (%p65_p1), [#allocation6], 4294966768 }
  0x38   : > { %1285 = dma.done.wait (%p65_p1), [#allocation9], 1024  }
  0x39   : > { %1287 = vsyncadd (%p65_p1), [#allocation9], 4294966272  ;;  %vm427_vm0 = vcmask 261120   ;;  %v426_v0 = vld [vmem:[%s362_s17] sm:$0xff]  ;;  %v1326_v2 = vmov 32.0   ;;  %v467_v23 = vld [vmem:[#allocation7] sm:$0xff] }
  0x3a   : > { %v428_v1 = vsel %vm427_vm0, %v426_v0, 0.0  ;;  %1014 = vrcp.f32 %v1326_v2  ;;  %v470_v14 = vld [vmem:[#allocation7 + $0x18] sm:$0xff]  ;;  %v469_v17 = vld [vmem:[#allocation7 + $0x10] sm:$0xff]  ;;  %v468_v20 = vld [vmem:[#allocation7 + $0x8] sm:$0xff]  ;;  %s1670_s2 = sld [smem:[#allocation22_spill]]  ;;  %s862_s4 = sshll.u32 %s1487_s23, 5 }
  0x3b   : > { %429 = vadd.xlane.f32.xlu0 %v428_v1  ;;  %v497_v15 = vld [vmem:[#allocation8 + $0x18] sm:$0xff]  ;;  %486 = vmatpush.msra.mxu0 %v470_v14  ;;  %v496_v18 = vld [vmem:[#allocation8 + $0x10] sm:$0xff]  ;;  %v495_v21 = vld [vmem:[#allocation8 + $0x8] sm:$0xff]  ;;  %vm542_vm5 = vcmask 64512   ;;  %s1512_s15 = scalar_lea.vmem [#allocation11], %s862_s4  ;;  %s1327_s18 = smov 104  }
  0x3c   : > { %v521_v16 = vld [vmem:[#allocation10 + $0x18] sm:$0xff]  ;;  %510 = vmatpush.msra.mxu1 %v497_v15  ;;  %v520_v19 = vld [vmem:[#allocation10 + $0x10] sm:$0xff]  ;;  %v519_v22 = vld [vmem:[#allocation10 + $0x8] sm:$0xff]  ;;  %s1328_s14 = smov 120   ;;  %s1516_s19 = scalar_lea.vmem [#allocation12], %s862_s4 }
  0x3d   : > { %534 = vmatpush.msra.mxu2 %v521_v16  ;;  %487 = vmatpush.msra.mxu0 %v469_v17  ;;  %v494_v24 = vld [vmem:[#allocation8] sm:$0xff]  ;;  %v1012_v35 = vld [vmem:[#allocation5] ss:$0 sm:$0xff]  ;;  %s1520_s22 = scalar_lea.vmem [#allocation14], %s862_s4  ;;  %s1329_s24 = smov 112  }
  0x3e   : > { %511 = vmatpush.msra.mxu1 %v496_v18  ;;  %v518_v25 = vld [vmem:[#allocation10] sm:$0xff]  ;;  %s1531_s26 = sshll.u32 %s1310_s30, 5  ;;  %s636_s25 = sshll.u32 %s1516_s19, 4  ;;  %s1547_s25 = int_to_ptr.vmem [resolvable:$true] %s636_s25 }
  0x3f   : > { %535 = vmatpush.msra.mxu2 %v520_v19  ;;  %488 = vmatpush.msra.mxu0 %v468_v20  ;;  %s635_s1 = scalar_lea.hbm %s1653_s7, %s1531_s26  ;;  %s653_s30 = scalar_lea.hbm %s1654_s8, %s1531_s26 }
  0x40   : > { %v1015_v3 = vpop.eup %1014  ;;  %512 = vmatpush.msra.mxu1 %v495_v21  ;;  %v1013_v38 = vld [vmem:[%s1670_s2] ss:$0 sm:$0xff]  ;;  %s1552_s0 = sshll.u32 %s653_s30, 4  ;;  %s1188_s4 = scalar_lea.hbm %s1653_s7, 64  ;;  %s657_s0 = int_to_ptr.hbm [resolvable:$true] %s1552_s0 }
  0x41   : > { %v432_v4 = vmul.f32 32.0, %v1015_v3  ;;  %vm436_vm1 = vweird.f32 %v1015_v3  ;;  %536 = vmatpush.msra.mxu2 %v519_v22  ;;  %489 = vmatpush.msra.mxu0 %v467_v23 }
  0x42   : > { %513 = vmatpush.msra.mxu1 %v494_v24 }
  0x43   : > { %v433_v5 = vsub.f32 1.0, %v432_v4  ;;  %537 = vmatpush.msra.mxu2 %v518_v25 }
  0x45   : > { %v434_v6 = vmul.f32 %v1015_v3, %v433_v5 }
  0x47   : > { %v435_v7 = vadd.f32 %v1015_v3, %v434_v6 }
  0x49   : > { %v437_v8 = vsel %vm436_vm1, %v1015_v3, %v435_v7 }
  0xae   : > { %v430_v9 = vpop.xlane.xlu0 %429 }
  0xaf   : > { %v438_v10 = vmul.f32 %v437_v8, %v430_v9 }
  0xb1   : > { %v439_v11 = vsub.f32 %v426_v0, %v438_v10 }
  0xb3   : > { %v440_v12 = vmul.f32 %v439_v11, %v439_v11 }
  0xb5   : > { %v441_v13 = vsel %vm427_vm0, %v440_v12, 0.0 }
  0xb6   : > { %442 = vadd.xlane.f32.xlu0 %v441_v13 }
 0x129   : > { %v443_v26 = vpop.xlane.xlu0 %442 }
 0x12a   : > { %v444_v27 = vmul.f32 %v443_v26, %v437_v8 }
 0x12c   : > { %v445_v28 = vadd.f32 1e-05, %v444_v27 }
 0x12e   : > { %1016 = vrsqrt.f32 %v445_v28  ;;  %vm452_vm3 = vweird.f32 %v445_v28 }
 0x134   : > { %v1017_v29 = vpop.eup %1016 }
 0x135   : > { %v447_v30 = vmul.f32 %v1017_v29, %v445_v28  ;;  %vm453_vm2 = vweird.f32 %v1017_v29 }
 0x136   : > { %vm454_vm4 = vmor %vm452_vm3, %vm453_vm2 }
 0x137   : > { %v448_v31 = vmul.f32 %v1017_v29, %v447_v30 }
 0x139   : > { %v449_v32 = vmul.f32 0.5, %v448_v31 }
 0x13b   : > { %v450_v33 = vsub.f32 1.5, %v449_v32 }
 0x13d   : > { %v451_v34 = vmul.f32 %v1017_v29, %v450_v33 }
 0x13f   : > { %v455_v36 = vsel %vm454_vm4, %v1017_v29, %v451_v34 }
 0x140   : > { %v456_v37 = vmul.f32 %v455_v36, %v439_v11 }
 0x142   : > { %v461_v39 = vmul.f32 %v1012_v35, %v456_v37 }
 0x144   : > { %v466_v40 = vadd.f32 %v1013_v38, %v461_v39 }
 0x146   : > { %865 = vmatmul.msk.f32.vlgmr.msra.gmra.mxu0 %vm427_vm0, %v466_v40  ;;  %866 = vmatmul.msk.f32.vlgmr.msra.gmra.mxu1 %vm427_vm0, %v466_v40 }
 0x147   : > { %867 = vmatmul.msk.f32.vlgmr.msra.gmra.mxu2 %vm427_vm0, %v466_v40 }
 0x1c3   : > { %v491_v41 = vpop.f32.mrf.mxu0  ;;  %v515_v42 = vpop.f32.mrf.mxu1 }
 0x1c4   : > { %543 = vst.msk [vmem:[%s1512_s15] sm:$0xff] %vm542_vm5, %v491_v41  ;;  %584 = vrot.lane.b32.xlu2 %v515_v42, %s1327_s18  ;;  %553 = vrot.lane.b32.xlu1 %v515_v42, %s1328_s14 }
 0x1c5   : > { %544 = vst.msk [vmem:[%s1516_s19] sm:$0xff] %vm542_vm5, %v515_v42 }
 0x1ca   : > { %v539_v43 = vpop.f32.mrf.mxu2 }
 0x1cb   : > { %545 = vst.msk [vmem:[%s1520_s22] sm:$0xff] %vm542_vm5, %v539_v43  ;;  %559 = vrot.lane.b32.xlu0 %v539_v43, %s1328_s14 }
 0x1cc   : > { %569 = vrot.lane.b32.xlu1 %v515_v42, %s1329_s24  ;;  %547 = vrot.lane.b32.xlu2 %v491_v41, %s1328_s14  ;;  %s1549_s14 = sshll.u32 %s635_s1, 4  ;;  %s639_s14 = int_to_ptr.hbm [resolvable:$true] %s1549_s14 }
 0x1cd   : > { %s1182_s20 = sshra.s32 %s639_s14, 4  ;;  %s1183_s20 = int_to_ptr.hbm [resolvable:$true] %s1182_s20 }
 0x1ce   : > { %s1184_s17 = scalar_lea.hbm %s1183_s20, 32  ;;  %p1189_p9 = scmp.lt.s32.totalorder %s1183_s20, %s1653_s7 }
 0x1cf   : > { %p1185_p1 = scmp.ne.s32.totalorder %s1183_s20, %s1184_s17  ;;  %p1190_p10 = scmp.lt.s32.totalorder %s1188_s4, %s1184_s17 }
 0x1d1   : > { %p1186_p3 = pnand %p1185_p1, %p1465_p0  ;;  %p1191_p12 = por %p1190_p10, %p1189_p9 }
 0x1d3   : > { %p1187_p8 = pneg %p1186_p3 }
 0x1d4   : > { %564 = vrot.lane.b32.xlu1 %v491_v41, %s1329_s24  ;;  %574 = vrot.lane.b32.xlu2 %v539_v43, %s1329_s24  ;;  %s654_s24 = sshll.u32 %s1520_s22, 4  ;;  %s1555_s24 = int_to_ptr.vmem [resolvable:$true] %s654_s24 }
 0x1d5   : > { %p1192_p13 = pnand %p1191_p12, %p1187_p8 }
 0x1dc   : > { %579 = vrot.lane.b32.xlu1 %v491_v41, %s1327_s18  ;;  %589 = vrot.lane.b32.xlu2 %v539_v43, %s1327_s18  ;;  %s599_s18 = sand.u32 1, %s1408_s11  }
 0x1dd   : > { %s1562_s11 = scalar_lea.sflag [#allocation13], %s599_s18 }
 0x21e   : > { %v585_v44 = vpop.permute.xlu2 %584 }
 0x21f   : > { %875 = vst.msk [vmem:[%s1516_s19 + $0x18] sm:$0xff] %vm542_vm5, %v585_v44 }
 0x226   : > { %v548_v45 = vpop.permute.xlu2 %547 }
 0x227   : > { %868 = vst.msk [vmem:[%s1512_s15 + $0x8] sm:$0xff] %vm542_vm5, %v548_v45 }
 0x22e   : > { %v575_v46 = vpop.permute.xlu2 %574 }
 0x22f   : > { %873 = vst.msk [vmem:[%s1520_s22 + $0x10] sm:$0xff] %vm542_vm5, %v575_v46 }
 0x236   : > { %v554_v47 = vpop.permute.xlu1 %553  ;;  %v590_v48 = vpop.permute.xlu2 %589 }
 0x237   : > { %869 = vst.msk [vmem:[%s1516_s19 + $0x8] sm:$0xff] %vm542_vm5, %v554_v47 }
 0x238   : > { %876 = vst.msk [vmem:[%s1520_s22 + $0x18] sm:$0xff] %vm542_vm5, %v590_v48 }
 0x23d   : > { %v560_v49 = vpop.permute.xlu0 %559 }
 0x23e   : > { %870 = vst.msk [vmem:[%s1520_s22 + $0x8] sm:$0xff] %vm542_vm5, %v560_v49  ;;  %v570_v50 = vpop.permute.xlu1 %569 }
 0x23f   : > { %872 = vst.msk [vmem:[%s1516_s19 + $0x10] sm:$0xff] %vm542_vm5, %v570_v50 }
 0x240   : > { %1195 = shalt.err (!%p1192_p13)
}
 0x241   : > { %s1330_s19 = smov 128   ;;  %s1331_s22 = smov 8  }
 0x242   : > { %910 = dma.vmem_to_hbm [thread:$0]  (%p1465_p0), %s1547_s25, 512, %s639_s14, %s1562_s11, %s1330_s19, %s1330_s19, %s1331_s22  }
 0x243   : > { %s1210_s18 = sshra.s32 %s657_s0, 4  ;;  %s1216_s1 = scalar_lea.hbm %s1654_s8, 64  ;;  %s1211_s18 = int_to_ptr.hbm [resolvable:$true] %s1210_s18 }
 0x244   : > { %s1212_s2 = scalar_lea.hbm %s1211_s18, 32  ;;  %p1217_p11 = scmp.lt.s32.totalorder %s1211_s18, %s1654_s8 }
 0x245   : > { %p1213_p2 = scmp.ne.s32.totalorder %s1211_s18, %s1212_s2  ;;  %p1218_p1 = scmp.lt.s32.totalorder %s1216_s1, %s1212_s2 }
 0x247   : > { %p1214_p5 = pnand %p1213_p2, %p1465_p0  ;;  %p1219_p3 = por %p1218_p1, %p1217_p11 }
 0x249   : > { %p1215_p7 = pneg %p1214_p5 }
 0x24b   : > { %p1220_p8 = pnand %p1219_p3, %p1215_p7 }
 0x24d   : > { %1223 = shalt.err (!%p1220_p8)
}
 0x24e   : > { %911 = dma.vmem_to_hbm [thread:$0]  (%p1465_p0), %s1555_s24, 512, %s657_s0, %s1562_s11, %s1330_s19, %s1330_s19, %s1331_s22   ;;  %v565_v51 = vpop.permute.xlu1 %564 }
 0x24f   : > { %871 = vst.msk [vmem:[%s1512_s15 + $0x10] sm:$0xff] %vm542_vm5, %v565_v51  ;;  %s617_s30 = scalar_lea.hbm %s1652_s6, %s1531_s26  ;;  %s618_s18 = sshll.u32 %s1512_s15, 4  ;;  %s619_s18 = int_to_ptr.vmem [resolvable:$true] %s618_s18 }
 0x250   : > { %s620_s2 = sshll.u32 %s617_s30, 4  ;;  %s595_s20 = scalar_lea.sflag [#allocation4], %s1487_s23  ;;  %s621_s2 = int_to_ptr.hbm [resolvable:$true] %s620_s2 }
 0x251   : > { %s1238_s17 = sshra.s32 %s621_s2, 4  ;;  %s1244_s11 = scalar_lea.hbm %s1652_s6, 64  ;;  %s1239_s17 = int_to_ptr.hbm [resolvable:$true] %s1238_s17 }
 0x252   : > { %s1240_s1 = scalar_lea.hbm %s1239_s17, 32  ;;  %p1245_p13 = scmp.lt.s32.totalorder %s1239_s17, %s1652_s6 }
 0x253   : > { %p1241_p9 = scmp.ne.s32.totalorder %s1239_s17, %s1240_s1  ;;  %p1246_p2 = scmp.lt.s32.totalorder %s1244_s11, %s1240_s1 }
 0x255   : > { %p1242_p10 = pnand %p1241_p9, %p1465_p0  ;;  %p1247_p5 = por %p1246_p2, %p1245_p13 }
 0x256   : > { %v580_v52 = vpop.permute.xlu1 %579 }
 0x257   : > { %874 = vst.msk [vmem:[%s1512_s15 + $0x18] sm:$0xff] %vm542_vm5, %v580_v52  ;;  %p1243_p12 = pneg %p1242_p10 }
 0x259   : > { %p1248_p7 = pnand %p1247_p5, %p1243_p12 }
 0x25b   : > { %1251 = shalt.err (!%p1248_p7)
}
 0x25c   : > { %909 = dma.vmem_to_hbm [thread:$0]  (%p1465_p0), %s619_s18, 512, %s621_s2, %s595_s20, %s1330_s19, %s1330_s19, %s1331_s22  }
 0x25d PF: > { %s671_s23 = sand.u32 1, %s1298_s27   ;;  %p933_p11 = pnand %p853_p4, %p1474_p6 }
 0x25e   : > { %s672_s15 = scalar_lea.sflag [#allocation4], %s671_s23 }
 0x25f   : > { %p934_p1 = pneg %p933_p11 }
 0x261   : > { %1289 = dma.done.wait (%p934_p1), %s672_s15, 512  }
 0x262   : > { %1291 = vsyncadd (%p934_p1), %s672_s15, 4294966784  ;;  %s1671_s4 = sadd.s32 4294967294, %s1318_s10  }
 0x263   : > { %s681_s25 = sand.u32 1, %s1671_s4  }
 0x264   : > { %s682_s12 = scalar_lea.sflag [#allocation13], %s681_s25 }
 0x265   : > { %1293 = dma.done.wait (%p934_p1), %s682_s12, 1024  }
 0x266   : > { %1295 = vsyncadd (%p934_p1), %s682_s12, 4294966272  ;;  %s30_s10 = sadd.s32 1, %s1318_s10   ;;  %s1672_s27 = smov %s1302_s28 }
 0x267   : > { %p27_p0 = scmp.ge.s32.totalorder %s30_s10, 4   ;;  %s1673_s28 = smov %s1306_s29 }
 0x268   : > { %s1674_s29 = smov %s1472_s13  ;;  %s1675_s30 = smov %s1314_s9 }
 0x269   : > { %s1676_s9 = smov %s1678_s21  ;;  %29 = sbr.rel (!%p27_p0) target bundleno = 16 (0x10), region = 146 }
 0x26e   :  { %698 = vsyncpa [#allocation3], 1 }
 0x26f   :  { %700 = vsyncpa [#allocation3 + $0x1], 1 }
 0x270   :  { %701 = vsyncpa [#allocation6], 1 }
 0x271   :  { %702 = vsyncpa [#allocation9], 1 }
 0x272   :  { %703 = vsyncpa [#allocation4], 1 }
 0x273   :  { %705 = vsyncpa [#allocation4 + $0x1], 1 }
 0x274   :  { %706 = vsyncpa [#allocation13], 1 }
 0x275   :  { %708 = vsyncpa [#allocation13 + $0x1], 1 }

</bundles_post_ra>
